<compile_context>
chip_gen: v7x
topology: tpu7x:2x2x1
jax: 0.10.0
libtpu: 0.0.40
codegen_flags: <defaults>
</compile_context>

<pallas_src>
import functools

import jax
import jax.numpy as jnp
from jax.experimental import pallas as pl
from jax.experimental.pallas import tpu as pltpu

N_OBJECTS = 2   # number of object models in the scene
T = 16          # frames per trajectory
N = 128         # 3D points per object (maps to TPU lanes)
K = 8           # low-rank basis size
Z_OFFSET = 3.0  # synthetic object model bias: keeps points in front of camera


def scene_kernel(coeff_ref, basis_ref, cam_ref, out_ref, *, n_obj, epsilon):
    """Single invocation: every object reconstructed + camera-projected at once.

    coeff_ref : (n_obj*3*T, K)  f32, per-object/per-channel low-rank coefficients (VMEM)
    basis_ref : (n_obj*3*K, N)  f32, stacked per-object/per-channel bases (VMEM)
    cam_ref   : (3,)            [focal, cx, cy] in SMEM
    out_ref   : (n_obj*5*T, N)  per object: [x, y, z, x_cam, y_cam] row blocks
    """
    focal = cam_ref[0]
    cx = cam_ref[1]
    cy = cam_ref[2]

    def small_dot(c_off, b_off):
        # Tiny (T, K) @ (K, N) sliver; bf16 operands -> single MXU pass,
        # f32 accumulation preserves precision (K = 8).
        lhs = coeff_ref[c_off:c_off + T, :].astype(jnp.bfloat16)
        rhs = basis_ref[b_off:b_off + K, :].astype(jnp.bfloat16)
        return jnp.dot(lhs, rhs, preferred_element_type=jnp.float32)

    # Static unrolled loop over objects: dot -> project -> store immediately,
    # so at most one object's coords are live at a time.
    for i in range(n_obj):
        cb = i * 3 * T     # row base into coeff
        bb = i * 3 * K     # row base into basis
        ob = i * 5 * T     # row base into output (multiple of 16 -> aligned)

        x = small_dot(cb, bb)                                   # (T, N)
        y = small_dot(cb + T, bb + K)
        z = small_dot(cb + 2 * T, bb + 2 * K) + Z_OFFSET

        # One reciprocal per object, shared between both projected coords.
        # approx=True -> EUP vrcp slot (otherwise idle), ~2^-12 rel error.
        inv = pl.reciprocal(z + epsilon, approx=True)
        scale = focal * inv
        x_cam = scale * x + cx
        y_cam = scale * y + cy

        # Direct, sublane-aligned, lane-dense (128-wide) stores.
        out_ref[ob:ob + T, :] = x
        out_ref[ob + T:ob + 2 * T, :] = y
        out_ref[ob + 2 * T:ob + 3 * T, :] = z
        out_ref[ob + 3 * T:ob + 4 * T, :] = x_cam
        out_ref[ob + 4 * T:ob + 5 * T, :] = y_cam


@functools.partial(jax.jit, static_argnames=("epsilon",))
def scene_forward(coeff, basis, cam_params, epsilon=1e-10):
    """Pallas-backed equivalent of ModelSceneMultipleObjects.forward().

    coeff      : (n_obj, 3, T, K) f32
    basis      : (n_obj, 3, K, N) f32
    cam_params : (3,) f32 -> [focal, cx, cy]

    Returns: [x_0, y_0, z_0, x_1, y_1, z_1, ...,
              x_cam_0, y_cam_0, x_cam_1, y_cam_1, ...,
              e_reg_obj, e_reg_cam]
    """
    n_obj = coeff.shape[0]

    # Raw inputs (no block-diagonal packing) — flat 2D views for simple
    # static slicing inside the kernel.
    coeff_k = coeff.reshape(n_obj * 3 * T, K)
    basis_k = basis.reshape(n_obj * 3 * K, N)

    kernel = functools.partial(scene_kernel, n_obj=n_obj, epsilon=float(epsilon))

    out = pl.pallas_call(
        kernel,
        out_shape=jax.ShapeDtypeStruct((n_obj * 5 * T, N), jnp.float32),
        in_specs=[
            pl.BlockSpec(memory_space=pltpu.MemorySpace.VMEM),   # coeff
            pl.BlockSpec(memory_space=pltpu.MemorySpace.VMEM),   # basis
            pl.BlockSpec(memory_space=pltpu.MemorySpace.SMEM),   # camera params
        ],
        out_specs=pl.BlockSpec(memory_space=pltpu.MemorySpace.VMEM),
    )(coeff_k, basis_k, cam_params)

    out = out.reshape(n_obj, 5, T, N)   # [x, y, z, x_cam, y_cam] per object

    # Tiny scalar regularizers: fused into the jitted wrapper program
    # (inputs already live at the JAX level; no extra launches post-jit).
    e_reg_obj = jnp.sum(coeff * coeff)
    e_reg_cam = jnp.sum(jnp.maximum(epsilon - out[:, 2], 0.0))

    # Re-assemble the exact PyTorch forward() return structure (pure glue).
    results_obj = []
    results_cam = []
    for i in range(n_obj):
        results_obj += [out[i, 0], out[i, 1], out[i, 2]]
        results_cam += [out[i, 3], out[i, 4]]
    return results_obj + results_cam + [e_reg_obj, e_reg_cam]


def _reference_forward(coeff, basis, cam_params, epsilon):
    """Pure-JAX float32 reference of the same synthetic scene (for checking)."""
    focal, cx, cy = cam_params[0], cam_params[1], cam_params[2]
    n_obj = coeff.shape[0]
    results_obj, results_cam = [], []
    e_reg_obj = jnp.float32(0.0)
    e_reg_cam = jnp.float32(0.0)
    for i in range(n_obj):
        x = coeff[i, 0] @ basis[i, 0]
        y = coeff[i, 1] @ basis[i, 1]
        z = coeff[i, 2] @ basis[i, 2] + Z_OFFSET
        e_reg_obj = e_reg_obj + jnp.sum(coeff[i] ** 2)
        x_cam = focal * x / (z + epsilon) + cx
        y_cam = focal * y / (z + epsilon) + cy
        e_reg_cam = e_reg_cam + jnp.sum(jnp.maximum(epsilon - z, 0.0))
        results_obj += [x, y, z]
        results_cam += [x_cam, y_cam]
    return results_obj + results_cam + [e_reg_obj, e_reg_cam]


if __name__ == "__main__":
    key = jax.random.PRNGKey(0)
    k_coeff, k_basis = jax.random.split(key)

    # Deterministic synthetic parameters (the module's __init__ receives the
    # sub-models; here their parameters are built in-script).
    coeff = 0.1 * jax.random.normal(k_coeff, (N_OBJECTS, 3, T, K), jnp.float32)
    basis = jax.random.normal(k_basis, (N_OBJECTS, 3, K, N), jnp.float32)
    cam_params = jnp.array([1.0, 0.0, 0.0], jnp.float32)   # focal, cx, cy

    results = scene_forward(coeff, basis, cam_params, epsilon=1e-10)
    results = jax.block_until_ready(results)

    # Structure: 3*n_obj object arrays + 2*n_obj camera arrays + 2 scalars.
    assert len(results) == 3 * N_OBJECTS + 2 * N_OBJECTS + 2
    assert all(bool(jnp.all(jnp.isfinite(r))) for r in results)

    # Structural / numerical sanity vs a pure-JAX f32 reference.  Tolerance is
    # loose because the kernel runs its MXU operands in bf16 (f32 accumulate)
    # and uses the approximate EUP reciprocal.
    reference = _reference_forward(coeff, basis, cam_params, 1e-10)
    for got, want in zip(results, reference):
        assert got.shape == want.shape
        assert bool(jnp.allclose(got, want, rtol=3e-2, atol=3e-2))

    print("KERNEL_OK")
</pallas_src>

<mosaic_0001>
module attributes {stable_mosaic.version = 11 : i64} {
  func.func @scene_kernel(%arg0: memref<96x8xf32, #tpu.memory_space<vmem>>, %arg1: memref<48x128xf32, #tpu.memory_space<vmem>>, %arg2: memref<3xf32, #tpu.memory_space<smem>>, %arg3: memref<160x128xf32, #tpu.memory_space<vmem>>) attributes {dimension_semantics = [], scalar_prefetch = 0 : i64, scratch_operands = 0 : i64, tpu.core_type = #tpu.core_type<tc>} {
    %c0 = arith.constant 0 : index
    %0 = memref.load %arg2[%c0] : memref<3xf32, #tpu.memory_space<smem>>
    %c1 = arith.constant 1 : index
    %1 = memref.load %arg2[%c1] : memref<3xf32, #tpu.memory_space<smem>>
    %c2 = arith.constant 2 : index
    %2 = memref.load %arg2[%c2] : memref<3xf32, #tpu.memory_space<smem>>
    %c0_0 = arith.constant 0 : index
    %c0_1 = arith.constant 0 : index
    %3 = vector.load %arg0[%c0_0, %c0_1] : memref<96x8xf32, #tpu.memory_space<vmem>>, vector<16x8xf32>
    %4 = arith.truncf %3 : vector<16x8xf32> to vector<16x8xbf16>
    %c0_2 = arith.constant 0 : index
    %c0_3 = arith.constant 0 : index
    %5 = vector.load %arg1[%c0_2, %c0_3] : memref<48x128xf32, #tpu.memory_space<vmem>>, vector<8x128xf32>
    %6 = arith.truncf %5 : vector<8x128xf32> to vector<8x128xbf16>
    %cst = arith.constant dense<0.000000e+00> : vector<16x128xf32>
    %7 = tpu.matmul %4, %6, %cst {dimension_numbers = #tpu.dot_dimension_numbers<[1], [0], [0], [1], [0, 0, 1, 1], [], []>} : vector<16x8xbf16>, vector<8x128xbf16>, vector<16x128xf32> -> vector<16x128xf32>
    %c16 = arith.constant 16 : index
    %c0_4 = arith.constant 0 : index
    %8 = vector.load %arg0[%c16, %c0_4] : memref<96x8xf32, #tpu.memory_space<vmem>>, vector<16x8xf32>
    %9 = arith.truncf %8 : vector<16x8xf32> to vector<16x8xbf16>
    %c8 = arith.constant 8 : index
    %c0_5 = arith.constant 0 : index
    %10 = vector.load %arg1[%c8, %c0_5] : memref<48x128xf32, #tpu.memory_space<vmem>>, vector<8x128xf32>
    %11 = arith.truncf %10 : vector<8x128xf32> to vector<8x128xbf16>
    %cst_6 = arith.constant dense<0.000000e+00> : vector<16x128xf32>
    %12 = tpu.matmul %9, %11, %cst_6 {dimension_numbers = #tpu.dot_dimension_numbers<[1], [0], [0], [1], [0, 0, 1, 1], [], []>} : vector<16x8xbf16>, vector<8x128xbf16>, vector<16x128xf32> -> vector<16x128xf32>
    %c32 = arith.constant 32 : index
    %c0_7 = arith.constant 0 : index
    %13 = vector.load %arg0[%c32, %c0_7] : memref<96x8xf32, #tpu.memory_space<vmem>>, vector<16x8xf32>
    %14 = arith.truncf %13 : vector<16x8xf32> to vector<16x8xbf16>
    %c16_8 = arith.constant 16 : index
    %c0_9 = arith.constant 0 : index
    %15 = vector.load %arg1[%c16_8, %c0_9] : memref<48x128xf32, #tpu.memory_space<vmem>>, vector<8x128xf32>
    %16 = arith.truncf %15 : vector<8x128xf32> to vector<8x128xbf16>
    %cst_10 = arith.constant dense<0.000000e+00> : vector<16x128xf32>
    %17 = tpu.matmul %14, %16, %cst_10 {dimension_numbers = #tpu.dot_dimension_numbers<[1], [0], [0], [1], [0, 0, 1, 1], [], []>} : vector<16x8xbf16>, vector<8x128xbf16>, vector<16x128xf32> -> vector<16x128xf32>
    %cst_11 = arith.constant 3.000000e+00 : f32
    %18 = vector.broadcast %cst_11 : f32 to vector<16x128xf32>
    %19 = arith.addf %17, %18 : vector<16x128xf32>
    %cst_12 = arith.constant 1.000000e-10 : f32
    %20 = vector.broadcast %cst_12 : f32 to vector<16x128xf32>
    %21 = arith.addf %19, %20 : vector<16x128xf32>
    %22 = tpu.reciprocal %21 {approx = true} : vector<16x128xf32> -> vector<16x128xf32>
    %23 = vector.broadcast %0 : f32 to vector<16x128xf32>
    %24 = arith.mulf %23, %22 : vector<16x128xf32>
    %25 = arith.mulf %24, %7 : vector<16x128xf32>
    %26 = vector.broadcast %1 : f32 to vector<16x128xf32>
    %27 = arith.addf %25, %26 : vector<16x128xf32>
    %28 = arith.mulf %24, %12 : vector<16x128xf32>
    %29 = vector.broadcast %2 : f32 to vector<16x128xf32>
    %30 = arith.addf %28, %29 : vector<16x128xf32>
    %c0_13 = arith.constant 0 : index
    %c0_14 = arith.constant 0 : index
    %31 = vector.load %arg3[%c0_13, %c0_14] : memref<160x128xf32, #tpu.memory_space<vmem>>, vector<16x128xf32>
    tpu.vector_store %arg3[%c0_13, %c0_14], %7 {strides = array<i32>} : memref<160x128xf32, #tpu.memory_space<vmem>>, vector<16x128xf32>,
    %c16_15 = arith.constant 16 : index
    %c0_16 = arith.constant 0 : index
    %32 = vector.load %arg3[%c16_15, %c0_16] : memref<160x128xf32, #tpu.memory_space<vmem>>, vector<16x128xf32>
    tpu.vector_store %arg3[%c16_15, %c0_16], %12 {strides = array<i32>} : memref<160x128xf32, #tpu.memory_space<vmem>>, vector<16x128xf32>,
    %c32_17 = arith.constant 32 : index
    %c0_18 = arith.constant 0 : index
    %33 = vector.load %arg3[%c32_17, %c0_18] : memref<160x128xf32, #tpu.memory_space<vmem>>, vector<16x128xf32>
    tpu.vector_store %arg3[%c32_17, %c0_18], %19 {strides = array<i32>} : memref<160x128xf32, #tpu.memory_space<vmem>>, vector<16x128xf32>,
    %c48 = arith.constant 48 : index
    %c0_19 = arith.constant 0 : index
    %34 = vector.load %arg3[%c48, %c0_19] : memref<160x128xf32, #tpu.memory_space<vmem>>, vector<16x128xf32>
    tpu.vector_store %arg3[%c48, %c0_19], %27 {strides = array<i32>} : memref<160x128xf32, #tpu.memory_space<vmem>>, vector<16x128xf32>,
    %c64 = arith.constant 64 : index
    %c0_20 = arith.constant 0 : index
    %35 = vector.load %arg3[%c64, %c0_20] : memref<160x128xf32, #tpu.memory_space<vmem>>, vector<16x128xf32>
    tpu.vector_store %arg3[%c64, %c0_20], %30 {strides = array<i32>} : memref<160x128xf32, #tpu.memory_space<vmem>>, vector<16x128xf32>,
    %c48_21 = arith.constant 48 : index
    %c0_22 = arith.constant 0 : index
    %36 = vector.load %arg0[%c48_21, %c0_22] : memref<96x8xf32, #tpu.memory_space<vmem>>, vector<16x8xf32>
    %37 = arith.truncf %36 : vector<16x8xf32> to vector<16x8xbf16>
    %c24 = arith.constant 24 : index
    %c0_23 = arith.constant 0 : index
    %38 = vector.load %arg1[%c24, %c0_23] : memref<48x128xf32, #tpu.memory_space<vmem>>, vector<8x128xf32>
    %39 = arith.truncf %38 : vector<8x128xf32> to vector<8x128xbf16>
    %cst_24 = arith.constant dense<0.000000e+00> : vector<16x128xf32>
    %40 = tpu.matmul %37, %39, %cst_24 {dimension_numbers = #tpu.dot_dimension_numbers<[1], [0], [0], [1], [0, 0, 1, 1], [], []>} : vector<16x8xbf16>, vector<8x128xbf16>, vector<16x128xf32> -> vector<16x128xf32>
    %c64_25 = arith.constant 64 : index
    %c0_26 = arith.constant 0 : index
    %41 = vector.load %arg0[%c64_25, %c0_26] : memref<96x8xf32, #tpu.memory_space<vmem>>, vector<16x8xf32>
    %42 = arith.truncf %41 : vector<16x8xf32> to vector<16x8xbf16>
    %c32_27 = arith.constant 32 : index
    %c0_28 = arith.constant 0 : index
    %43 = vector.load %arg1[%c32_27, %c0_28] : memref<48x128xf32, #tpu.memory_space<vmem>>, vector<8x128xf32>
    %44 = arith.truncf %43 : vector<8x128xf32> to vector<8x128xbf16>
    %cst_29 = arith.constant dense<0.000000e+00> : vector<16x128xf32>
    %45 = tpu.matmul %42, %44, %cst_29 {dimension_numbers = #tpu.dot_dimension_numbers<[1], [0], [0], [1], [0, 0, 1, 1], [], []>} : vector<16x8xbf16>, vector<8x128xbf16>, vector<16x128xf32> -> vector<16x128xf32>
    %c80 = arith.constant 80 : index
    %c0_30 = arith.constant 0 : index
    %46 = vector.load %arg0[%c80, %c0_30] : memref<96x8xf32, #tpu.memory_space<vmem>>, vector<16x8xf32>
    %47 = arith.truncf %46 : vector<16x8xf32> to vector<16x8xbf16>
    %c40 = arith.constant 40 : index
    %c0_31 = arith.constant 0 : index
    %48 = vector.load %arg1[%c40, %c0_31] : memref<48x128xf32, #tpu.memory_space<vmem>>, vector<8x128xf32>
    %49 = arith.truncf %48 : vector<8x128xf32> to vector<8x128xbf16>
    %cst_32 = arith.constant dense<0.000000e+00> : vector<16x128xf32>
    %50 = tpu.matmul %47, %49, %cst_32 {dimension_numbers = #tpu.dot_dimension_numbers<[1], [0], [0], [1], [0, 0, 1, 1], [], []>} : vector<16x8xbf16>, vector<8x128xbf16>, vector<16x128xf32> -> vector<16x128xf32>
    %cst_33 = arith.constant 3.000000e+00 : f32
    %51 = vector.broadcast %cst_33 : f32 to vector<16x128xf32>
    %52 = arith.addf %50, %51 : vector<16x128xf32>
    %cst_34 = arith.constant 1.000000e-10 : f32
    %53 = vector.broadcast %cst_34 : f32 to vector<16x128xf32>
    %54 = arith.addf %52, %53 : vector<16x128xf32>
    %55 = tpu.reciprocal %54 {approx = true} : vector<16x128xf32> -> vector<16x128xf32>
    %56 = vector.broadcast %0 : f32 to vector<16x128xf32>
    %57 = arith.mulf %56, %55 : vector<16x128xf32>
    %58 = arith.mulf %57, %40 : vector<16x128xf32>
    %59 = vector.broadcast %1 : f32 to vector<16x128xf32>
    %60 = arith.addf %58, %59 : vector<16x128xf32>
    %61 = arith.mulf %57, %45 : vector<16x128xf32>
    %62 = vector.broadcast %2 : f32 to vector<16x128xf32>
    %63 = arith.addf %61, %62 : vector<16x128xf32>
    %c80_35 = arith.constant 80 : index
    %c0_36 = arith.constant 0 : index
    %64 = vector.load %arg3[%c80_35, %c0_36] : memref<160x128xf32, #tpu.memory_space<vmem>>, vector<16x128xf32>
    tpu.vector_store %arg3[%c80_35, %c0_36], %40 {strides = array<i32>} : memref<160x128xf32, #tpu.memory_space<vmem>>, vector<16x128xf32>,
    %c96 = arith.constant 96 : index
    %c0_37 = arith.constant 0 : index
    %65 = vector.load %arg3[%c96, %c0_37] : memref<160x128xf32, #tpu.memory_space<vmem>>, vector<16x128xf32>
    tpu.vector_store %arg3[%c96, %c0_37], %45 {strides = array<i32>} : memref<160x128xf32, #tpu.memory_space<vmem>>, vector<16x128xf32>,
    %c112 = arith.constant 112 : index
    %c0_38 = arith.constant 0 : index
    %66 = vector.load %arg3[%c112, %c0_38] : memref<160x128xf32, #tpu.memory_space<vmem>>, vector<16x128xf32>
    tpu.vector_store %arg3[%c112, %c0_38], %52 {strides = array<i32>} : memref<160x128xf32, #tpu.memory_space<vmem>>, vector<16x128xf32>,
    %c128 = arith.constant 128 : index
    %c0_39 = arith.constant 0 : index
    %67 = vector.load %arg3[%c128, %c0_39] : memref<160x128xf32, #tpu.memory_space<vmem>>, vector<16x128xf32>
    tpu.vector_store %arg3[%c128, %c0_39], %60 {strides = array<i32>} : memref<160x128xf32, #tpu.memory_space<vmem>>, vector<16x128xf32>,
    %c144 = arith.constant 144 : index
    %c0_40 = arith.constant 0 : index
    %68 = vector.load %arg3[%c144, %c0_40] : memref<160x128xf32, #tpu.memory_space<vmem>>, vector<16x128xf32>
    tpu.vector_store %arg3[%c144, %c0_40], %63 {strides = array<i32>} : memref<160x128xf32, #tpu.memory_space<vmem>>, vector<16x128xf32>,
    return
  }
}

</mosaic_0001>

<bundles_post_ra>
// kernel: scene_forward.1
= control target key start
LH: loop header
LB: loop body
LE: loop exit
PB: predicated region body
PF: predicated region fallthrough
CT: control target
= control target key end

     0   :  { %8 = vsyncpa [#allocation3], 0  ;;  %s640_s0 = inlined_call_operand.vmem [shape: f32[96,8], index: 0, kind: input, shape index: {}]   ;;  %s641_s1 = inlined_call_operand.vmem [shape: f32[48,128], index: 1, kind: input, shape index: {}]   ;;  %s642_s2 = inlined_call_operand.vmem [shape: f32[3], index: 2, kind: input, shape index: {}]   ;;  %s643_s3 = inlined_call_operand.vmem [shape: f32[160,128], index: 3, kind: output, shape index: {}]  }
   0x1   :  { %s19_s14 = sshll.u32 %s642_s2, 4  ;;  %s20_s14 = int_to_ptr.vmem [resolvable:$true] %s19_s14 }
   0x2   :  { %s468_s15 = scalar_lea.vmem %s20_s14, 16  ;;  %p473_p1 = scmp.lt.s32.totalorder %s20_s14, %s20_s14 }
   0x3   :  { %p469_p0 = scmp.ne.s32.totalorder %s20_s14, %s468_s15  ;;  %p474_p2 = scmp.lt.s32.totalorder %s468_s15, %s468_s15 }
   0x5   :  { %p475_p3 = por %p474_p2, %p473_p1 }
   0x7   :  { %p476_p4 = pnand %p475_p3, %p469_p0 }
   0x9   :  { %479 = shalt.err (!%p476_p4)
}
   0xa   :  { %s482_s16 = smov [#allocation2]  }
   0xb   :  { %22 = dma.vmem_to_smem %s20_s14, 16, %s482_s16, [#allocation3]  }
   0xc   :  { %480 = dma.done.wait [#allocation3], 16  }
   0xd   :  { %481 = vsyncadd [#allocation3], 4294967280 }
   0xe   :  { %26 = sfence }
   0xf   :  { %v34_v0 = vld [vmem:[%s641_s1] sm:$0xff]  ;;  %vm40_vm0 = vcmask 1043456   ;;  %v88_v1 = vld [vmem:[%s641_s1 + $0x8] sm:$0xff]  ;;  %v483_v3 = vmov 0.0   ;;  %v85_v7 = vld [vmem:[%s640_s0 + $0x10] sm:$0xff]  ;;  %vm484_vm1 = vmmov 0  }
  0x10   :  { %v31_v2 = vld [vmem:[%s640_s0] sm:$0xff]  ;;  %421 = vmatprep.subr.bf16.mxu0 %v483_v3  ;;  %427 = vmatprep.subr.bf16.mxu1 %v483_v3  ;;  %v35_v4 = vpack.c.bf16 %v34_v0, %v34_v0  ;;  %v89_v5 = vpack.c.bf16 %v88_v1, %v88_v1  ;;  %v32_v6 = vld [vmem:[%s640_s0 + $0x8] sm:$0xff]  ;;  %v86_v8 = vld [vmem:[%s640_s0 + $0x18] sm:$0xff]  ;;  %vm36_vm2 = vcmask 64512   ;;  %s28_s11 = sld [smem:[#allocation2]]  ;;  %s401_s12 = sld [smem:[#allocation2 + $0x1]] }
  0x11   :  { %423 = vmatprep.mubr.msk.bf16.mxu0 %vm484_vm1, %v483_v3  ;;  %429 = vmatprep.mubr.msk.bf16.mxu1 %vm484_vm1, %v483_v3  ;;  %v33_v9 = vpack.c.bf16 %v32_v6, %v31_v2  ;;  %v87_v10 = vpack.c.bf16 %v86_v8, %v85_v7  ;;  %v219_v11 = vld [vmem:[%s641_s1 + $0x18] sm:$0xff]  ;;  %v140_v12 = vld [vmem:[%s641_s1 + $0x10] sm:$0xff]  ;;  %v323_v19 = vld [vmem:[%s641_s1 + $0x28] sm:$0xff]  ;;  %s402_s13 = sld [smem:[#allocation2 + $0x2]] }
  0x12   :  { %v42_v13 = vsel %vm40_vm0, %v35_v4, 0  ;;  %v94_v14 = vsel %vm40_vm0, %v89_v5, 0  ;;  %v220_v15 = vpack.c.bf16 %v219_v11, %v219_v11  ;;  %v141_v16 = vpack.c.bf16 %v140_v12, %v140_v12  ;;  %v137_v20 = vld [vmem:[%s640_s0 + $0x20] sm:$0xff]  ;;  %v138_v22 = vld [vmem:[%s640_s0 + $0x28] sm:$0xff]  ;;  %v216_v23 = vld [vmem:[%s640_s0 + $0x30] sm:$0xff] }
  0x13   :  { %422 = vmatpush3.bf16.msra.mxu0 %v42_v13  ;;  %428 = vmatpush3.bf16.msra.mxu1 %v94_v14  ;;  %v271_v21 = vld [vmem:[%s641_s1 + $0x20] sm:$0xff]  ;;  %v217_v24 = vld [vmem:[%s640_s0 + $0x38] sm:$0xff]  ;;  %v324_v25 = vpack.c.bf16 %v323_v19, %v323_v19  ;;  %v139_v27 = vpack.c.bf16 %v138_v22, %v137_v20  ;;  %v320_v31 = vld [vmem:[%s640_s0 + $0x50] sm:$0xff] }
  0x14   :  { %439 = vmatprep.subr.bf16.mxu1 %v483_v3  ;;  %v225_v17 = vsel %vm40_vm0, %v220_v15, 0  ;;  %433 = vmatprep.subr.bf16.mxu0 %v483_v3  ;;  %v146_v18 = vsel %vm40_vm0, %v141_v16, 0  ;;  %v272_v26 = vpack.c.bf16 %v271_v21, %v271_v21  ;;  %v218_v28 = vpack.c.bf16 %v217_v24, %v216_v23  ;;  %v321_v32 = vld [vmem:[%s640_s0 + $0x58] sm:$0xff]  ;;  %v268_v33 = vld [vmem:[%s640_s0 + $0x40] sm:$0xff]  ;;  %v269_v34 = vld [vmem:[%s640_s0 + $0x48] sm:$0xff] }
  0x15   :  { %v329_v29 = vsel %vm40_vm0, %v324_v25, 0  ;;  %v322_v35 = vpack.c.bf16 %v321_v32, %v320_v31  ;;  %v270_v36 = vpack.c.bf16 %v269_v34, %v268_v33 }
  0x16   :  { %424 = vmatmul.mubr.msk.bf16.vlgmr.msra.gmra.mrb[0].mxu0 %vm36_vm2, %v33_v9  ;;  %430 = vmatmul.mubr.msk.bf16.vlgmr.msra.gmra.mrb[0].mxu1 %vm36_vm2, %v87_v10  ;;  %v277_v30 = vsel %vm40_vm0, %v272_v26, 0  ;;  %v193_v5 = vstv %s28_s11  ;;  %v198_v9 = vstv %s401_s12 }
  0x17   :  { %440 = vmatpush3.bf16.msra.mxu1 %v225_v17  ;;  %434 = vmatpush3.bf16.msra.mxu0 %v146_v18  ;;  %v203_v10 = vstv %s402_s13 }
  0x18   :  { %435 = vmatprep.mubr.msk.bf16.mxu0 %vm484_vm1, %v483_v3  ;;  %441 = vmatprep.mubr.msk.bf16.mxu1 %vm484_vm1, %v483_v3 }
  0x19   :  { %451 = vmatprep.subr.bf16.mxu1 %v483_v3  ;;  %445 = vmatprep.subr.bf16.mxu0 %v483_v3 }
  0x1e   :  { %436 = vmatmul.mubr.msk.bf16.vlgmr.msra.gmra.mrb[4].mxu0 %vm36_vm2, %v139_v27  ;;  %442 = vmatmul.mubr.msk.bf16.vlgmr.msra.gmra.mrb[4].mxu1 %vm36_vm2, %v218_v28 }
  0x1f   :  { %452 = vmatpush3.bf16.msra.mxu1 %v329_v29  ;;  %453 = vmatprep.mubr.msk.bf16.mxu1 %vm484_vm1, %v483_v3 }
  0x20   :  { %446 = vmatpush3.bf16.msra.mxu0 %v277_v30  ;;  %447 = vmatprep.mubr.msk.bf16.mxu0 %vm484_vm1, %v483_v3 }
  0x26   :  { %454 = vmatmul.mubr.msk.bf16.vlgmr.msra.gmra.mrb[8].mxu1 %vm36_vm2, %v322_v35  ;;  %448 = vmatmul.mubr.msk.bf16.vlgmr.msra.gmra.mrb[8].mxu0 %vm36_vm2, %v270_v36 }
  0xe9   :  { %v130_v37 = vpop.f32.mrb[0].mxu1  ;;  %v78_v38 = vpop.f32.mrb[0].mxu0 }
  0xea   :  { %208 = vst [vmem:[%s643_s3 + $0x10] sm:$0xff] %v130_v37  ;;  %v431_v39 = vpop.f32.mrb[1].mxu1  ;;  %206 = vst [vmem:[%s643_s3] sm:$0xff] %v78_v38  ;;  %v425_v40 = vpop.f32.mrb[1].mxu0 }
  0xeb   :  { %v133_v41 = vpop.f32.mrb[2].mxu1  ;;  %v81_v42 = vpop.f32.mrb[2].mxu0 }
  0xec   :  { %209 = vst [vmem:[%s643_s3 + $0x18] sm:$0xff] %v133_v41  ;;  %v432_v43 = vpop.f32.mrb[3].mxu1  ;;  %207 = vst [vmem:[%s643_s3 + $0x8] sm:$0xff] %v81_v42  ;;  %v426_v44 = vpop.f32.mrb[3].mxu0 }
  0xf1   :  { %v182_v45 = vpop.f32.mrb[4].mxu0  ;;  %v261_v46 = vpop.f32.mrb[4].mxu1 }
  0xf2   :  { %v183_v47 = vadd.f32 3.0, %v182_v45  ;;  %386 = vst [vmem:[%s643_s3 + $0x50] sm:$0xff] %v261_v46  ;;  %v437_v48 = vpop.f32.mrb[5].mxu0  ;;  %v443_v49 = vpop.f32.mrb[5].mxu1 }
  0xf3   :  { %v185_v50 = vpop.f32.mrb[6].mxu0  ;;  %v264_v51 = vpop.f32.mrb[6].mxu1 }
  0xf4   :  { %v189_v52 = vadd.f32 1e-10, %v183_v47  ;;  %210 = vst [vmem:[%s643_s3 + $0x20] sm:$0xff] %v183_v47  ;;  %v186_v53 = vadd.f32 3.0, %v185_v50  ;;  %387 = vst [vmem:[%s643_s3 + $0x58] sm:$0xff] %v264_v51  ;;  %v444_v54 = vpop.f32.mrb[7].mxu1 }
  0xf5   :  { %v438_v55 = vpop.f32.mrb[7].mxu0 }
  0xf6   :  { %460 = vrcp.f32 %v189_v52  ;;  %v190_v56 = vadd.f32 1e-10, %v186_v53  ;;  %211 = vst [vmem:[%s643_s3 + $0x28] sm:$0xff] %v186_v53 }
  0xf8   :  { %462 = vrcp.f32 %v190_v56 }
  0xf9   :  { %v365_v57 = vpop.f32.mrb[8].mxu1  ;;  %v313_v58 = vpop.f32.mrb[8].mxu0 }
  0xfa   :  { %v366_v59 = vadd.f32 3.0, %v365_v57  ;;  %v455_v60 = vpop.f32.mrb[9].mxu1  ;;  %388 = vst [vmem:[%s643_s3 + $0x60] sm:$0xff] %v313_v58  ;;  %v449_v61 = vpop.f32.mrb[9].mxu0 }
  0xfb   :  { %v368_v62 = vpop.f32.mrb[10].mxu1  ;;  %v316_v63 = vpop.f32.mrb[10].mxu0 }
  0xfc   :  { %v372_v0 = vadd.f32 1e-10, %v366_v59  ;;  %390 = vst [vmem:[%s643_s3 + $0x70] sm:$0xff] %v366_v59  ;;  %v369_v1 = vadd.f32 3.0, %v368_v62  ;;  %v456_v2 = vpop.f32.mrb[11].mxu1  ;;  %389 = vst [vmem:[%s643_s3 + $0x68] sm:$0xff] %v316_v63 }
  0xfd   :  { %v450_v3 = vpop.f32.mrb[11].mxu0 }
  0xfe   :  { %464 = vrcp.f32 %v372_v0  ;;  %v373_v4 = vadd.f32 1e-10, %v369_v1  ;;  %391 = vst [vmem:[%s643_s3 + $0x78] sm:$0xff] %v369_v1 }
 0x100   :  { %v461_v6 = vpop.eup %460  ;;  %466 = vrcp.f32 %v373_v4 }
 0x101   :  { %v194_v7 = vmul.f32 %v461_v6, %v193_v5 }
 0x102   :  { %v463_v8 = vpop.eup %462 }
 0x103   :  { %v195_v11 = vmul.f32 %v463_v8, %v193_v5  ;;  %v196_v12 = vmul.f32 %v194_v7, %v78_v38  ;;  %v201_v13 = vmul.f32 %v194_v7, %v130_v37 }
 0x105   :  { %v197_v14 = vmul.f32 %v195_v11, %v81_v42  ;;  %v199_v15 = vadd.f32 %v198_v9, %v196_v12  ;;  %v202_v16 = vmul.f32 %v195_v11, %v133_v41  ;;  %v204_v17 = vadd.f32 %v203_v10, %v201_v13 }
 0x107   :  { %v200_v18 = vadd.f32 %v198_v9, %v197_v14  ;;  %v205_v19 = vadd.f32 %v203_v10, %v202_v16  ;;  %212 = vst [vmem:[%s643_s3 + $0x30] sm:$0xff] %v199_v15  ;;  %214 = vst [vmem:[%s643_s3 + $0x40] sm:$0xff] %v204_v17 }
 0x108   :  { %v465_v20 = vpop.eup %464 }
 0x109   :  { %213 = vst [vmem:[%s643_s3 + $0x38] sm:$0xff] %v200_v18  ;;  %215 = vst [vmem:[%s643_s3 + $0x48] sm:$0xff] %v205_v19  ;;  %v376_v21 = vmul.f32 %v465_v20, %v193_v5 }
 0x10a   :  { %v467_v22 = vpop.eup %466 }
 0x10b   :  { %v378_v23 = vmul.f32 %v376_v21, %v261_v46  ;;  %v382_v24 = vmul.f32 %v376_v21, %v313_v58  ;;  %v377_v25 = vmul.f32 %v467_v22, %v193_v5 }
 0x10d   :  { %v380_v26 = vadd.f32 %v378_v23, %v198_v9  ;;  %v384_v27 = vadd.f32 %v382_v24, %v203_v10  ;;  %v379_v28 = vmul.f32 %v377_v25, %v264_v51  ;;  %v383_v29 = vmul.f32 %v377_v25, %v316_v63 }
 0x10f   :  { %392 = vst [vmem:[%s643_s3 + $0x80] sm:$0xff] %v380_v26  ;;  %394 = vst [vmem:[%s643_s3 + $0x90] sm:$0xff] %v384_v27  ;;  %v381_v30 = vadd.f32 %v379_v28, %v198_v9  ;;  %v385_v31 = vadd.f32 %v383_v29, %v203_v10 }
 0x111   :  { %393 = vst [vmem:[%s643_s3 + $0x88] sm:$0xff] %v381_v30  ;;  %395 = vst [vmem:[%s643_s3 + $0x98] sm:$0xff] %v385_v31 }
 0x112   :  { %400 = vsyncpa [#allocation3], 1 }

</bundles_post_ra>
